<compile_context>
chip_gen: v6e
topology: v6e:2x2x1
jax: 0.10.0
libtpu: 0.0.40
codegen_flags: <defaults>
</compile_context>

<pallas_src>
import jax
import jax.numpy as jnp
from jax import lax
from jax.experimental import pallas as pl
from jax.experimental.pallas import tpu as pltpu


def _make_dense_layer_kernel(H, W):
    HW = H * W

    def kernel(x_ref, s1_ref, b1_ref, w1t_ref, b2_ref, w2m_ref, mask_ref, o_ref):
        # x_ref   : (1, Cin, HW)   channels on sublanes, pixels on lanes
        # s1/b1   : (Cin, 1)       folded BN1 scale / shift
        # w1t     : (Cmid, Cin)    bf16 1x1-conv weight, BN2 scale pre-folded
        # b2      : (Cmid, 1)      folded BN2 shift
        # w2m     : (9*Cout, Cmid) bf16 3x3-conv weight, tap-major (dy*3+dx)
        # mask    : (9, 1, HW)     f32 halo masks (1 = valid, 0 = zero padding)
        # o_ref   : (1, Cout, HW)
        cout = o_ref.shape[1]

        xf = x_ref[0].astype(jnp.float32)                         # (Cin, HW)
        t = jnp.maximum(xf * s1_ref[...] + b1_ref[...], 0.0)      # BN1 + ReLU
        m = jnp.dot(w1t_ref[...], t.astype(jnp.bfloat16),
                    preferred_element_type=jnp.float32)           # 1x1 conv (BN2 scale folded)
        m = jnp.maximum(m + b2_ref[...], 0.0)                     # BN2 shift + ReLU
        mb = m.astype(jnp.bfloat16)                               # (Cmid, HW)

        # All 9 taps in a single MXU matmul: (9*Cout, Cmid) @ (Cmid, HW).
        u_all = jnp.dot(w2m_ref[...], mb, preferred_element_type=jnp.float32)

        acc = jnp.zeros((cout, HW), jnp.float32)
        for tap in range(9):
            dy, dx = tap // 3, tap % 3
            off = (dy - 1) * W + (dx - 1)                         # flattened pixel shift
            u = u_all[tap * cout:(tap + 1) * cout]                # (Cout, HW), static slice
            if off != 0:
                # out[p] needs u[p + off]  =>  roll towards lower indices (XLU).
                u = pltpu.roll(u, shift=(-off) % HW, axis=1)
            if not (dy == 1 and dx == 1):                         # center tap: no halo
                u = u * mask_ref[tap]                             # (1, HW) broadcast
            acc = acc + u

        o_ref[0] = acc.astype(o_ref.dtype)

    return kernel


def _halo_masks(H, W):
    """(9, 1, H*W) float32 validity masks for the 3x3 taps (1 valid, 0 padded)."""
    HW = H * W
    yy = jnp.arange(H, dtype=jnp.int32).reshape(H, 1)
    xx = jnp.arange(W, dtype=jnp.int32).reshape(1, W)
    masks = []
    for dy in range(3):
        for dx in range(3):
            ok = ((xx + (dx - 1) >= 0) & (xx + (dx - 1) <= W - 1) &
                  (yy + (dy - 1) >= 0) & (yy + (dy - 1) <= H - 1))   # (H, W)
            masks.append(ok.reshape(1, HW))
    return jnp.stack(masks, axis=0).astype(jnp.float32)


def _vmem_limit_bytes():
    # <= half of physical VMEM, capped at 64 MiB: 32 MiB on v7x, 64 MiB on v5e/v6e.
    try:
        cap = int(pltpu.get_tpu_info().vmem_capacity_bytes)
        return min(cap // 2, 64 * 1024 * 1024)
    except Exception:
        return 32 * 1024 * 1024


def dense_layer_forward(x_nchw, params):
    """Fused _DenseLayer forward (inference).  x: (N, Cin, H, W) NCHW."""
    eps = 1e-5
    (g1, bta1, rm1, rv1, w_conv1, g2, bta2, rm2, rv2, w_conv2) = params
    N, Cin, H, W = x_nchw.shape
    Cmid = w_conv1.shape[0]     # bn_size * growth_rate
    Cout = w_conv2.shape[0]     # growth_rate
    HW = H * W

    # Fold BatchNorm (inference, running stats) into per-channel scale/shift.
    inv1 = g1 / jnp.sqrt(rv1 + eps)
    inv2 = g2 / jnp.sqrt(rv2 + eps)
    s1 = inv1.reshape(Cin, 1).astype(jnp.float32)
    b1 = (bta1 - rm1 * inv1).reshape(Cin, 1).astype(jnp.float32)
    b2 = (bta2 - rm2 * inv2).reshape(Cmid, 1).astype(jnp.float32)

    # 1x1 conv weight with BN2 scale folded into its output rows (OIHW -> (Cmid, Cin)).
    w1t = (w_conv1[:, :, 0, 0] * inv2[:, None]).astype(jnp.bfloat16)
    # 3x3 conv weight, tap-major: rows [tap*Cout:(tap+1)*Cout] hold tap (dy, dx).
    w2m = jnp.transpose(w_conv2, (2, 3, 0, 1)).reshape(9 * Cout, Cmid).astype(jnp.bfloat16)

    masks = _halo_masks(H, W)                               # (9, 1, HW)

    # Free reshape: NCHW -> (N, C, H*W); pixels become the lane dimension.
    x_flat = x_nchw.reshape(N, Cin, HW)

    kernel = _make_dense_layer_kernel(H, W)
    param_specs = [
        pl.BlockSpec((Cin, 1), lambda n: (0, 0)),
        pl.BlockSpec((Cin, 1), lambda n: (0, 0)),
        pl.BlockSpec((Cmid, Cin), lambda n: (0, 0)),
        pl.BlockSpec((Cmid, 1), lambda n: (0, 0)),
        pl.BlockSpec((9 * Cout, Cmid), lambda n: (0, 0)),
        pl.BlockSpec((9, 1, HW), lambda n: (0, 0, 0)),
    ]
    compiler_params = pltpu.CompilerParams(
        dimension_semantics=("parallel",),          # shards batch across TCs on v7x
        vmem_limit_bytes=_vmem_limit_bytes())

    # Fused concat: kernel writes its Cout new channels straight into the
    # (N, Cin+Cout, HW) result buffer (aliased input->output); the x channels
    # never move again.  Needs sublane-/block-aligned channel offsets, which
    # real DenseNet channel counts (multiples of growth_rate >= 8) always give.
    fused_concat = (Cin % Cout == 0) and (Cin % 8 == 0) and (Cout % 8 == 0)

    if fused_concat:
        Ctot = Cin + Cout
        # In a full DenseNet block this buffer is allocated once at the block's
        # final channel count and threaded through every layer, so this
        # pad-with-zeros copy happens once, not per layer.
        buf = jnp.concatenate(
            [x_flat, jnp.zeros((N, Cout, HW), x_nchw.dtype)], axis=1)
        out_flat = pl.pallas_call(
            kernel,
            out_shape=jax.ShapeDtypeStruct((N, Ctot, HW), x_nchw.dtype),
            grid=(N,),
            in_specs=[pl.BlockSpec((1, Cin, HW), lambda n: (n, 0, 0))] + param_specs,
            out_specs=pl.BlockSpec((1, Cout, HW), lambda n: (n, Cin // Cout, 0)),
            input_output_aliases={0: 0},
            compiler_params=compiler_params,
        )(buf, s1, b1, w1t, b2, w2m, masks)
        return out_flat.reshape(N, Ctot, H, W)

    # Fallback: separate output channels + XLA concatenate.
    new_flat = pl.pallas_call(
        kernel,
        out_shape=jax.ShapeDtypeStruct((N, Cout, HW), x_nchw.dtype),
        grid=(N,),
        in_specs=[pl.BlockSpec((1, Cin, HW), lambda n: (n, 0, 0))] + param_specs,
        out_specs=pl.BlockSpec((1, Cout, HW), lambda n: (n, 0, 0)),
        compiler_params=compiler_params,
    )(x_flat, s1, b1, w1t, b2, w2m, masks)
    out_nchw = new_flat.reshape(N, Cout, H, W)
    return jnp.concatenate([x_nchw, out_nchw], axis=1)


def reference_forward(x, params):
    """Pure-JAX reference mirroring the PyTorch module (inference mode)."""
    eps = 1e-5
    (g1, bta1, rm1, rv1, w1, g2, bta2, rm2, rv2, w2) = params

    def bn(v, g, b, m, var):
        return ((v - m[None, :, None, None])
                / jnp.sqrt(var[None, :, None, None] + eps)
                * g[None, :, None, None] + b[None, :, None, None])

    t = jax.nn.relu(bn(x, g1, bta1, rm1, rv1))
    mid = lax.conv_general_dilated(t, w1, (1, 1), 'VALID',
                                   dimension_numbers=('NCHW', 'OIHW', 'NCHW'),
                                   precision=lax.Precision.HIGHEST)
    mid = jax.nn.relu(bn(mid, g2, bta2, rm2, rv2))
    out = lax.conv_general_dilated(mid, w2, (1, 1), ((1, 1), (1, 1)),
                                   dimension_numbers=('NCHW', 'OIHW', 'NCHW'),
                                   precision=lax.Precision.HIGHEST)
    return jnp.concatenate([x, out], axis=1)


if __name__ == "__main__":
    key = jax.random.PRNGKey(0)
    N, Cin, H, W = 2, 8, 16, 16
    growth_rate, bn_size, drop_rate = 8, 4, 0.0
    Cmid = bn_size * growth_rate       # 32
    Cout = growth_rate                 # 8

    ks = jax.random.split(key, 11)
    x = jax.random.normal(ks[0], (N, Cin, H, W), jnp.float32)
    # Deterministic synthetic parameters (shapes follow the module __init__).
    g1 = jax.random.uniform(ks[1], (Cin,), jnp.float32, 0.5, 1.5)
    bta1 = 0.1 * jax.random.normal(ks[2], (Cin,), jnp.float32)
    rm1 = 0.1 * jax.random.normal(ks[3], (Cin,), jnp.float32)
    rv1 = jax.random.uniform(ks[4], (Cin,), jnp.float32, 0.5, 1.5)
    w_conv1 = 0.2 * jax.random.normal(ks[5], (Cmid, Cin, 1, 1), jnp.float32)
    g2 = jax.random.uniform(ks[6], (Cmid,), jnp.float32, 0.5, 1.5)
    bta2 = 0.1 * jax.random.normal(ks[7], (Cmid,), jnp.float32)
    rm2 = 0.1 * jax.random.normal(ks[8], (Cmid,), jnp.float32)
    rv2 = jax.random.uniform(ks[9], (Cmid,), jnp.float32, 0.5, 1.5)
    w_conv2 = 0.1 * jax.random.normal(ks[10], (Cout, Cmid, 3, 3), jnp.float32)

    params = (g1, bta1, rm1, rv1, w_conv1, g2, bta2, rm2, rv2, w_conv2)

    fwd = jax.jit(dense_layer_forward)
    out = jax.block_until_ready(fwd(x, params))
    ref = jax.block_until_ready(reference_forward(x, params))

    assert out.shape == (N, Cin + Cout, H, W), out.shape
    max_diff = float(jnp.max(jnp.abs(out - ref)))
    tol = 1e-2 * (1.0 + float(jnp.max(jnp.abs(ref))))
    assert max_diff < tol, f"max_diff={max_diff} tol={tol}"
    print("KERNEL_OK")
</pallas_src>

<mosaic_0001>
module attributes {stable_mosaic.version = 11 : i64} {
  func.func @kernel(%arg0: i32, %arg1: memref<1x8x256xf32, #tpu.memory_space<vmem>>, %arg2: memref<8x1xf32, #tpu.memory_space<vmem>>, %arg3: memref<8x1xf32, #tpu.memory_space<vmem>>, %arg4: memref<32x8xbf16, #tpu.memory_space<vmem>>, %arg5: memref<32x1xf32, #tpu.memory_space<vmem>>, %arg6: memref<72x32xbf16, #tpu.memory_space<vmem>>, %arg7: memref<9x1x256xf32, #tpu.memory_space<vmem>>, %arg8: memref<1x8x256xf32, #tpu.memory_space<vmem>>) attributes {dimension_semantics = [#tpu.dimension_semantics<parallel>], iteration_bounds = array<i64: 2>, scalar_prefetch = 0 : i64, scratch_operands = 0 : i64, tpu.core_type = #tpu.core_type<tc>, window_params = [{transform_indices = @transform_0, window_bounds = array<i64: 1, 8, 256>}, {pipeline_mode = #tpu.pipeline_mode<synchronous>, transform_indices = @transform_1, window_bounds = array<i64: 8, 1>}, {pipeline_mode = #tpu.pipeline_mode<synchronous>, transform_indices = @transform_2, window_bounds = array<i64: 8, 1>}, {pipeline_mode = #tpu.pipeline_mode<synchronous>, transform_indices = @transform_3, window_bounds = array<i64: 32, 8>}, {pipeline_mode = #tpu.pipeline_mode<synchronous>, transform_indices = @transform_4, window_bounds = array<i64: 32, 1>}, {pipeline_mode = #tpu.pipeline_mode<synchronous>, transform_indices = @transform_5, window_bounds = array<i64: 72, 32>}, {pipeline_mode = #tpu.pipeline_mode<synchronous>, transform_indices = @transform_6, window_bounds = array<i64: 9, 1, 256>}, {transform_indices = @transform_7, window_bounds = array<i64: 1, 8, 256>}]} {
    %c0 = arith.constant 0 : index
    %c0_0 = arith.constant 0 : index
    %c0_1 = arith.constant 0 : index
    %0 = vector.load %arg1[%c0, %c0_0, %c0_1] : memref<1x8x256xf32, #tpu.memory_space<vmem>>, vector<1x8x256xf32>
    %1 = vector.shape_cast %0 : vector<1x8x256xf32> to vector<8x256xf32>
    %c0_2 = arith.constant 0 : index
    %c0_3 = arith.constant 0 : index
    %2 = vector.load %arg2[%c0_2, %c0_3] : memref<8x1xf32, #tpu.memory_space<vmem>>, vector<8x1xf32>
    %3 = vector.broadcast %2 : vector<8x1xf32> to vector<8x256xf32>
    %4 = arith.mulf %1, %3 : vector<8x256xf32>
    %c0_4 = arith.constant 0 : index
    %c0_5 = arith.constant 0 : index
    %5 = vector.load %arg3[%c0_4, %c0_5] : memref<8x1xf32, #tpu.memory_space<vmem>>, vector<8x1xf32>
    %6 = vector.broadcast %5 : vector<8x1xf32> to vector<8x256xf32>
    %7 = arith.addf %4, %6 : vector<8x256xf32>
    %cst = arith.constant 0.000000e+00 : f32
    %8 = vector.broadcast %cst : f32 to vector<8x256xf32>
    %9 = arith.maximumf %7, %8 : vector<8x256xf32>
    %c0_6 = arith.constant 0 : index
    %c0_7 = arith.constant 0 : index
    %10 = vector.load %arg4[%c0_6, %c0_7] : memref<32x8xbf16, #tpu.memory_space<vmem>>, vector<32x8xbf16>
    %11 = arith.truncf %9 : vector<8x256xf32> to vector<8x256xbf16>
    %cst_8 = arith.constant dense<0.000000e+00> : vector<32x256xf32>
    %12 = tpu.matmul %10, %11, %cst_8 {dimension_numbers = #tpu.dot_dimension_numbers<[1], [0], [0], [1], [0, 0, 1, 1], [], []>} : vector<32x8xbf16>, vector<8x256xbf16>, vector<32x256xf32> -> vector<32x256xf32>
    %c0_9 = arith.constant 0 : index
    %c0_10 = arith.constant 0 : index
    %13 = vector.load %arg5[%c0_9, %c0_10] : memref<32x1xf32, #tpu.memory_space<vmem>>, vector<32x1xf32>
    %14 = vector.broadcast %13 : vector<32x1xf32> to vector<32x256xf32>
    %15 = arith.addf %12, %14 : vector<32x256xf32>
    %cst_11 = arith.constant 0.000000e+00 : f32
    %16 = vector.broadcast %cst_11 : f32 to vector<32x256xf32>
    %17 = arith.maximumf %15, %16 : vector<32x256xf32>
    %18 = arith.truncf %17 : vector<32x256xf32> to vector<32x256xbf16>
    %c0_12 = arith.constant 0 : index
    %c0_13 = arith.constant 0 : index
    %19 = vector.load %arg6[%c0_12, %c0_13] : memref<72x32xbf16, #tpu.memory_space<vmem>>, vector<72x32xbf16>
    %cst_14 = arith.constant dense<0.000000e+00> : vector<72x256xf32>
    %20 = tpu.matmul %19, %18, %cst_14 {dimension_numbers = #tpu.dot_dimension_numbers<[1], [0], [0], [1], [0, 0, 1, 1], [], []>} : vector<72x32xbf16>, vector<32x256xbf16>, vector<72x256xf32> -> vector<72x256xf32>
    %cst_15 = arith.constant 0.000000e+00 : f32
    %21 = vector.broadcast %cst_15 : f32 to vector<8x256xf32>
    %22 = vector.extract_strided_slice %20 {offsets = [0, 0], sizes = [8, 256], strides = [1, 1]} : vector<72x256xf32> to vector<8x256xf32>
    %c17_i32 = arith.constant 17 : i32
    %23 = tpu.dynamic_rotate %22 by %c17_i32 dim 1 : vector<8x256xf32>, i32 -> vector<8x256xf32>
    %c0_16 = arith.constant 0 : index
    %c0_17 = arith.constant 0 : index
    %c0_18 = arith.constant 0 : index
    %24 = vector.load %arg7[%c0_16, %c0_17, %c0_18] : memref<9x1x256xf32, #tpu.memory_space<vmem>>, vector<1x1x256xf32>
    %25 = vector.shape_cast %24 : vector<1x1x256xf32> to vector<1x256xf32>
    %26 = vector.broadcast %25 : vector<1x256xf32> to vector<8x256xf32>
    %27 = arith.mulf %23, %26 : vector<8x256xf32>
    %28 = arith.addf %21, %27 : vector<8x256xf32>
    %29 = vector.extract_strided_slice %20 {offsets = [8, 0], sizes = [8, 256], strides = [1, 1]} : vector<72x256xf32> to vector<8x256xf32>
    %c16_i32 = arith.constant 16 : i32
    %30 = tpu.dynamic_rotate %29 by %c16_i32 dim 1 : vector<8x256xf32>, i32 -> vector<8x256xf32>
    %c1 = arith.constant 1 : index
    %c0_19 = arith.constant 0 : index
    %c0_20 = arith.constant 0 : index
    %31 = vector.load %arg7[%c1, %c0_19, %c0_20] : memref<9x1x256xf32, #tpu.memory_space<vmem>>, vector<1x1x256xf32>
    %32 = vector.shape_cast %31 : vector<1x1x256xf32> to vector<1x256xf32>
    %33 = vector.broadcast %32 : vector<1x256xf32> to vector<8x256xf32>
    %34 = arith.mulf %30, %33 : vector<8x256xf32>
    %35 = arith.addf %28, %34 : vector<8x256xf32>
    %36 = vector.extract_strided_slice %20 {offsets = [16, 0], sizes = [8, 256], strides = [1, 1]} : vector<72x256xf32> to vector<8x256xf32>
    %c15_i32 = arith.constant 15 : i32
    %37 = tpu.dynamic_rotate %36 by %c15_i32 dim 1 : vector<8x256xf32>, i32 -> vector<8x256xf32>
    %c2 = arith.constant 2 : index
    %c0_21 = arith.constant 0 : index
    %c0_22 = arith.constant 0 : index
    %38 = vector.load %arg7[%c2, %c0_21, %c0_22] : memref<9x1x256xf32, #tpu.memory_space<vmem>>, vector<1x1x256xf32>
    %39 = vector.shape_cast %38 : vector<1x1x256xf32> to vector<1x256xf32>
    %40 = vector.broadcast %39 : vector<1x256xf32> to vector<8x256xf32>
    %41 = arith.mulf %37, %40 : vector<8x256xf32>
    %42 = arith.addf %35, %41 : vector<8x256xf32>
    %43 = vector.extract_strided_slice %20 {offsets = [24, 0], sizes = [8, 256], strides = [1, 1]} : vector<72x256xf32> to vector<8x256xf32>
    %c1_i32 = arith.constant 1 : i32
    %44 = tpu.dynamic_rotate %43 by %c1_i32 dim 1 : vector<8x256xf32>, i32 -> vector<8x256xf32>
    %c3 = arith.constant 3 : index
    %c0_23 = arith.constant 0 : index
    %c0_24 = arith.constant 0 : index
    %45 = vector.load %arg7[%c3, %c0_23, %c0_24] : memref<9x1x256xf32, #tpu.memory_space<vmem>>, vector<1x1x256xf32>
    %46 = vector.shape_cast %45 : vector<1x1x256xf32> to vector<1x256xf32>
    %47 = vector.broadcast %46 : vector<1x256xf32> to vector<8x256xf32>
    %48 = arith.mulf %44, %47 : vector<8x256xf32>
    %49 = arith.addf %42, %48 : vector<8x256xf32>
    %50 = vector.extract_strided_slice %20 {offsets = [32, 0], sizes = [8, 256], strides = [1, 1]} : vector<72x256xf32> to vector<8x256xf32>
    %51 = arith.addf %49, %50 : vector<8x256xf32>
    %52 = vector.extract_strided_slice %20 {offsets = [40, 0], sizes = [8, 256], strides = [1, 1]} : vector<72x256xf32> to vector<8x256xf32>
    %c255_i32 = arith.constant 255 : i32
    %53 = tpu.dynamic_rotate %52 by %c255_i32 dim 1 : vector<8x256xf32>, i32 -> vector<8x256xf32>
    %c5 = arith.constant 5 : index
    %c0_25 = arith.constant 0 : index
    %c0_26 = arith.constant 0 : index
    %54 = vector.load %arg7[%c5, %c0_25, %c0_26] : memref<9x1x256xf32, #tpu.memory_space<vmem>>, vector<1x1x256xf32>
    %55 = vector.shape_cast %54 : vector<1x1x256xf32> to vector<1x256xf32>
    %56 = vector.broadcast %55 : vector<1x256xf32> to vector<8x256xf32>
    %57 = arith.mulf %53, %56 : vector<8x256xf32>
    %58 = arith.addf %51, %57 : vector<8x256xf32>
    %59 = vector.extract_strided_slice %20 {offsets = [48, 0], sizes = [8, 256], strides = [1, 1]} : vector<72x256xf32> to vector<8x256xf32>
    %c241_i32 = arith.constant 241 : i32
    %60 = tpu.dynamic_rotate %59 by %c241_i32 dim 1 : vector<8x256xf32>, i32 -> vector<8x256xf32>
    %c6 = arith.constant 6 : index
    %c0_27 = arith.constant 0 : index
    %c0_28 = arith.constant 0 : index
    %61 = vector.load %arg7[%c6, %c0_27, %c0_28] : memref<9x1x256xf32, #tpu.memory_space<vmem>>, vector<1x1x256xf32>
    %62 = vector.shape_cast %61 : vector<1x1x256xf32> to vector<1x256xf32>
    %63 = vector.broadcast %62 : vector<1x256xf32> to vector<8x256xf32>
    %64 = arith.mulf %60, %63 : vector<8x256xf32>
    %65 = arith.addf %58, %64 : vector<8x256xf32>
    %66 = vector.extract_strided_slice %20 {offsets = [56, 0], sizes = [8, 256], strides = [1, 1]} : vector<72x256xf32> to vector<8x256xf32>
    %c240_i32 = arith.constant 240 : i32
    %67 = tpu.dynamic_rotate %66 by %c240_i32 dim 1 : vector<8x256xf32>, i32 -> vector<8x256xf32>
    %c7 = arith.constant 7 : index
    %c0_29 = arith.constant 0 : index
    %c0_30 = arith.constant 0 : index
    %68 = vector.load %arg7[%c7, %c0_29, %c0_30] : memref<9x1x256xf32, #tpu.memory_space<vmem>>, vector<1x1x256xf32>
    %69 = vector.shape_cast %68 : vector<1x1x256xf32> to vector<1x256xf32>
    %70 = vector.broadcast %69 : vector<1x256xf32> to vector<8x256xf32>
    %71 = arith.mulf %67, %70 : vector<8x256xf32>
    %72 = arith.addf %65, %71 : vector<8x256xf32>
    %73 = vector.extract_strided_slice %20 {offsets = [64, 0], sizes = [8, 256], strides = [1, 1]} : vector<72x256xf32> to vector<8x256xf32>
    %c239_i32 = arith.constant 239 : i32
    %74 = tpu.dynamic_rotate %73 by %c239_i32 dim 1 : vector<8x256xf32>, i32 -> vector<8x256xf32>
    %c8 = arith.constant 8 : index
    %c0_31 = arith.constant 0 : index
    %c0_32 = arith.constant 0 : index
    %75 = vector.load %arg7[%c8, %c0_31, %c0_32] : memref<9x1x256xf32, #tpu.memory_space<vmem>>, vector<1x1x256xf32>
    %76 = vector.shape_cast %75 : vector<1x1x256xf32> to vector<1x256xf32>
    %77 = vector.broadcast %76 : vector<1x256xf32> to vector<8x256xf32>
    %78 = arith.mulf %74, %77 : vector<8x256xf32>
    %79 = arith.addf %72, %78 : vector<8x256xf32>
    %c0_33 = arith.constant 0 : index
    %c0_34 = arith.constant 0 : index
    %c0_35 = arith.constant 0 : index
    %80 = vector.load %arg8[%c0_33, %c0_34, %c0_35] : memref<1x8x256xf32, #tpu.memory_space<vmem>>, vector<1x8x256xf32>
    %81 = vector.shape_cast %80 : vector<1x8x256xf32> to vector<8x256xf32>
    %82 = vector.shape_cast %79 : vector<8x256xf32> to vector<1x8x256xf32>
    tpu.vector_store %arg8[%c0_33, %c0_34, %c0_35], %82 {strides = array<i32>} : memref<1x8x256xf32, #tpu.memory_space<vmem>>, vector<1x8x256xf32>,
    return
  }
  func.func @transform_0(%arg0: i32) -> (i32, i32, i32) {
    %c0_i32 = arith.constant 0 : i32
    %c0_i32_0 = arith.constant 0 : i32
    %c0_i32_1 = arith.constant 0 : i32
    return %arg0, %c0_i32, %c0_i32_0 : i32, i32, i32
  }
  func.func @transform_1(%arg0: i32) -> (i32, i32) {
    %c0_i32 = arith.constant 0 : i32
    %c0_i32_0 = arith.constant 0 : i32
    %c0_i32_1 = arith.constant 0 : i32
    return %c0_i32, %c0_i32_0 : i32, i32
  }
  func.func @transform_2(%arg0: i32) -> (i32, i32) {
    %c0_i32 = arith.constant 0 : i32
    %c0_i32_0 = arith.constant 0 : i32
    %c0_i32_1 = arith.constant 0 : i32
    return %c0_i32, %c0_i32_0 : i32, i32
  }
  func.func @transform_3(%arg0: i32) -> (i32, i32) {
    %c0_i32 = arith.constant 0 : i32
    %c0_i32_0 = arith.constant 0 : i32
    %c0_i32_1 = arith.constant 0 : i32
    return %c0_i32, %c0_i32_0 : i32, i32
  }
  func.func @transform_4(%arg0: i32) -> (i32, i32) {
    %c0_i32 = arith.constant 0 : i32
    %c0_i32_0 = arith.constant 0 : i32
    %c0_i32_1 = arith.constant 0 : i32
    return %c0_i32, %c0_i32_0 : i32, i32
  }
  func.func @transform_5(%arg0: i32) -> (i32, i32) {
    %c0_i32 = arith.constant 0 : i32
    %c0_i32_0 = arith.constant 0 : i32
    %c0_i32_1 = arith.constant 0 : i32
    return %c0_i32, %c0_i32_0 : i32, i32
  }
  func.func @transform_6(%arg0: i32) -> (i32, i32, i32) {
    %c0_i32 = arith.constant 0 : i32
    %c0_i32_0 = arith.constant 0 : i32
    %c0_i32_1 = arith.constant 0 : i32
    %c0_i32_2 = arith.constant 0 : i32
    return %c0_i32, %c0_i32_0, %c0_i32_1 : i32, i32, i32
  }
  func.func @transform_7(%arg0: i32) -> (i32, i32, i32) {
    %c1_i32 = arith.constant 1 : i32
    %c0_i32 = arith.constant 0 : i32
    %c0_i32_0 = arith.constant 0 : i32
    return %arg0, %c1_i32, %c0_i32 : i32, i32, i32
  }
}

</mosaic_0001>

<bundles_post_ra>
// kernel: dense_layer_forward.1
= control target key start
LH: loop header
LB: loop body
LE: loop exit
PB: predicated region body
PF: predicated region fallthrough
CT: control target
= control target key end

     0   :  { %s936_s24 = smov 0   ;;  %s1076_s0 = inlined_call_operand.vmem [shape: f32[2,16,256], index: 0, kind: input, shape index: {}, may-alias: {0,7}]   ;;  %s1077_s1 = inlined_call_operand.vmem [shape: f32[8,1], index: 1, kind: input, shape index: {}]   ;;  %s1078_s2 = inlined_call_operand.vmem [shape: f32[8,1], index: 2, kind: input, shape index: {}]   ;;  %s1079_s3 = inlined_call_operand.vmem [shape: bf16[32,8], index: 3, kind: input, shape index: {}]   ;;  %s1080_s4 = inlined_call_operand.vmem [shape: f32[32,1], index: 4, kind: input, shape index: {}]   ;;  %s1081_s5 = inlined_call_operand.vmem [shape: bf16[72,32], index: 5, kind: input, shape index: {}]   ;;  %s1082_s6 = inlined_call_operand.vmem [shape: f32[9,1,256], index: 6, kind: input, shape index: {}]   ;;  %s1083_s7 = inlined_call_operand.vmem [shape: f32[2,16,256], index: 7, kind: output, shape index: {}, may-alias: {0,7}]  }
   0x1 LB: > { %s812_s25 = sadd.s32 4294967295, %s885_s24   ;;  %p816_p0 = scmp.ge.s32.totalorder %s885_s24, 1  ;;  %s885_s24 = sphi %s936_s24, %s17_s24  }
   0x2   : > { %p237_p1 = scmp.lt.s32.totalorder %s885_s24, 3 }
   0x4   : > { %p238_p2 = pnand %p816_p0, %p237_p1 }
   0x5   : > { %p270_p3 = scmp.lt.s32.totalorder (!%p238_p2), %s812_s25, 1  ;;  %s888_s12 = smov (!%p238_p2), 17  }
   0x6   : > { %241 = sbr.rel (%p238_p2) target bundleno = 716 (0x2cc), region = 48  ;;  %s889_s13 = smov (!%p238_p2), 15  }
   0x7   : > { %s890_s14 = smov (!%p238_p2), 16   ;;  %s891_s16 = smov (!%p238_p2), 1  }
   0x8   : > { %s892_s17 = smov (!%p238_p2), 127   ;;  %s894_s19 = smov (!%p238_p2), 112  }
   0x9   : > { %s895_s20 = smov (!%p238_p2), 111  }
   0xb   : > { %v284_v0 = vld [vmem:[%s1077_s1] sm:$0xff]  ;;  %v887_v1 = vmov 0   ;;  %v310_v4 = vld [vmem:[%s1080_s4 + $0x10] sm:$0xff]  ;;  %v311_v5 = vld [vmem:[%s1080_s4 + $0x18] sm:$0xff]  ;;  %s1085_s25 = smov (!%p270_p3, %s812_s25), 1  ;;  %vm349_vm0 = vcmask 1043456  }
   0xc   : > { %870 = vset.pattern.permute.xlu0 %v887_v1  ;;  %388 = vmatprep.mubr.bf16.mxu0 %v887_v1  ;;  %v292_v2 = vld [vmem:[%s1078_s2] sm:$0xff]  ;;  %v309_v6 = vld [vmem:[%s1080_s4 + $0x8] sm:$0xff]  ;;  %s847_s15 = sshll.u32 %s1085_s25, 5  ;;  %vm342_vm1 = vcmask 64512   ;;  %vm453_vm2 = vcmask 261120   ;;  %v876_v56 = vld [vmem:[%s1081_s5 + $0x10] sm:$0xff]  }
   0xd   : > { %287 = vperm.xlu0 %870, %v284_v0   ;;  %871 = vset.pattern.permute.xlu1 %v887_v1  ;;  %v308_v3 = vld [vmem:[%s1080_s4] sm:$0xff]  ;;  %s274_s18 = scalar_lea.vmem %s1076_s0, %s847_s15  ;;  %v873_v21 = vld [vmem:[%s1079_s3 + $0x8] sm:$0xff]   ;;  %v877_v57 = vld [vmem:[%s1081_s5 + $0x18] sm:$0xff]  }
   0xe   : > { %511 = vmatprep.mubr.bf16.mxu1 %v887_v1  ;;  %324 = vperm.xlu1 %871, %v310_v4   ;;  %v282_v8 = vld [vmem:[%s274_s18] sm:$0xff]  ;;  %v283_v9 = vld [vmem:[%s274_s18 + $0x8] sm:$0xff]  ;;  %s893_s18 = smov 113  }
   0xf   : > { %v872_v20 = vld [vmem:[%s1079_s3] sm:$0xff]   ;;  %v875_v55 = vld [vmem:[%s1081_s5 + $0x8] sm:$0xff]  }
  0x10   : > { %v874_v54 = vld [vmem:[%s1081_s5] sm:$0xff]  }
  0x11   : > { %295 = vperm.xlu0 %870, %v292_v2   ;;  %v878_v58 = vld [vmem:[%s1081_s5 + $0x20] ss:$0 sps:$4 sm:$0xff]  }
  0x12   : > { %329 = vperm.xlu1 %871, %v311_v5  }
  0x15   : > { %314 = vperm.xlu0 %870, %v308_v3  }
  0x16   : > { %319 = vperm.xlu1 %871, %v309_v6  }
  0x88   : > { %v288_v7 = vpop.permute.xlu0 %287 }
  0x89   : > { %v290_v10 = vmul.f32 %v288_v7, %v282_v8  ;;  %v291_v11 = vmul.f32 %v288_v7, %v283_v9  ;;  %v325_v22 = vpop.permute.xlu1 %324 }
  0x8c   : > { %v296_v12 = vpop.permute.xlu0 %295 }
  0x8d   : > { %v298_v13 = vadd.f32 %v296_v12, %v290_v10  ;;  %v299_v14 = vadd.f32 %v296_v12, %v291_v11  ;;  %v330_v26 = vpop.permute.xlu1 %329 }
  0x8f   : > { %v300_v15 = vmax.f32 %v298_v13, 0.0  ;;  %v301_v16 = vmax.f32 %v299_v14, 0.0 }
  0x90   : > { %v315_v35 = vpop.permute.xlu0 %314 }
  0x91   : > { %v307_v17 = vpack.c.bf16 %v301_v16, %v301_v16  ;;  %v306_v18 = vpack.c.bf16 %v300_v15, %v300_v15  ;;  %v320_v30 = vpop.permute.xlu1 %319  ;;  %v554_v15 = vlaneseq }
  0x93   : > { %823 = vmatprep.subr.msk.bf16.mxu0 %vm349_vm0, %v307_v17  ;;  %v351_v19 = vsel %vm349_vm0, %v306_v18, 0  ;;  %v562_v16 = vshrl.u32 %v554_v15, 7  ;;  %v1004_v18 = vand.u32 127, %v554_v15 }
  0x94   : > { %371 = vmatpush1.bf16.msra.mxu0 %v351_v19 }
  0x95   : > { %vm556_vm3 = vcmp.lt.s32.totalorder %v1004_v18, 17  ;;  %vm603_vm4 = vcmp.lt.s32.totalorder %v1004_v18, 15  ;;  %vm579_vm5 = vcmp.lt.s32.totalorder %v1004_v18, 16  ;;  %vm627_vm6 = vcmp.lt.s32.totalorder %v1004_v18, 1 }
  0x96   : > { %vm653_vm7 = vcmp.lt.s32.totalorder %v1004_v18, 127  ;;  %vm677_vm8 = vcmp.lt.s32.totalorder %v1004_v18, 113  ;;  %vm701_vm9 = vcmp.lt.s32.totalorder %v1004_v18, 112  ;;  %vm725_vm10 = vcmp.lt.s32.totalorder %v1004_v18, 111 }
  0x97   : > { %824 = vmatmul.mubr.msk.bf16.vlgmr.msra.gmra.mxu0 %vm342_vm1, %v872_v20  ;;  %v1006_v20 = vsub.s32 0, %v562_v16 }
  0x98   : > { %398 = vmatprep.mubr.bf16.mxu0 %v887_v1 }
  0x9f   : > { %825 = vmatmul.mubr.msk.bf16.gmra.mxu0 %vm342_vm1, %v873_v21  ;;  %v1008_v21 = vsub.s32 1, %v562_v16 }
  0xa0   : > { %501 = vmatprep.mubr.bf16.mxu0 %v887_v1 }
 0x157   : > { %v390_v23 = vpop.f32.mrf.mxu0 }
 0x158   : > { %v391_v45 = vadd.f32 %v390_v23, %v315_v35 }
 0x159   : > { %v392_v24 = vpop.f32.mrf.mxu0 }
 0x15a   : > { %v393_v38 = vadd.f32 %v392_v24, %v315_v35  ;;  %v409_v52 = vmax.f32 %v391_v45, 0.0  ;;  %v836_v24 = vld [vmem:[%s1082_s6 + $0x2] sm:$0x3] }
 0x15b   : > { %v394_v25 = vpop.f32.mrf.mxu0 }
 0x15c   : > { %v395_v40 = vadd.f32 %v394_v25, %v320_v30  ;;  %v410_v47 = vmax.f32 %v393_v38, 0.0  ;;  %v837_v25 = vld [vmem:[%s1082_s6 + $0x4] sm:$0x3] }
 0x15d   : > { %v396_v27 = vpop.f32.mrf.mxu0  ;;  %v612_v35 = vrot.slane %v837_v25, %v1006_v20 }
 0x15e   : > { %v397_v32 = vadd.f32 %v396_v27, %v320_v30  ;;  %v411_v49 = vmax.f32 %v395_v40, 0.0 }
 0x15f   : > { %v400_v28 = vpop.f32.mrf.mxu0 }
 0x160   : > { %v401_v36 = vadd.f32 %v400_v28, %v325_v22  ;;  %v412_v42 = vmax.f32 %v397_v32, 0.0  ;;  %v417_v53 = vpack.c.bf16 %v411_v49, %v409_v52  ;;  %v592_v32 = vrot.slane %v836_v24, %v1008_v21 }
 0x161   : > { %v402_v29 = vpop.f32.mrf.mxu0 }
 0x162   : > { %v403_v33 = vadd.f32 %v402_v29, %v325_v22  ;;  %v413_v46 = vmax.f32 %v401_v36, 0.0  ;;  %v418_v51 = vpack.c.bf16 %v412_v42, %v410_v47  ;;  %v559_v22 = vld [vmem:[%s1082_s6] sm:$0x3]  ;;  %v838_v29 = vld [vmem:[%s1082_s6 + $0x6] sm:$0x3]  ;;  %v616_v36 = vrot.slane %v837_v25, %v1008_v21 }
 0x163   : > { %v404_v31 = vpop.f32.mrf.mxu0  ;;  %v564_v27 = vrot.slane %v559_v22, %v1006_v20  ;;  %v568_v28 = vrot.slane %v559_v22, %v1008_v21  ;;  %v636_v38 = vrot.slane %v838_v29, %v1006_v20  ;;  %v842_v25 = vld [vmem:[%s1082_s6 + $0x10] sm:$0x3] }
 0x164   : > { %v405_v34 = vadd.f32 %v404_v31, %v330_v26  ;;  %v414_v43 = vmax.f32 %v403_v33, 0.0  ;;  %v588_v31 = vrot.slane %v836_v24, %v1006_v20 }
 0x165   : > { %v406_v37 = vpop.f32.mrf.mxu0 }
 0x166   : > { %v407_v39 = vadd.f32 %v406_v37, %v330_v26  ;;  %v415_v41 = vmax.f32 %v405_v34, 0.0 }
 0x168   : > { %v416_v44 = vmax.f32 %v407_v39, 0.0  ;;  %v419_v50 = vpack.c.bf16 %v415_v41, %v413_v46  ;;  %v640_v39 = vrot.slane %v838_v29, %v1008_v21 }
 0x16a   : > { %v420_v48 = vpack.c.bf16 %v416_v44, %v414_v43 }
 0x16c   : > { %481 = vmatprep.subr.bf16.mxu0 %v420_v48  ;;  %849 = vmatprep.subr.bf16.mxu1 %v420_v48 }
 0x16d   : > { %482 = vmatpush1.bf16.msra.mxu0 %v419_v50  ;;  %851 = vmatpush1.bf16.msra.mxu1 %v419_v50 }
 0x16e   : > { %483 = vmatprep.subr.bf16.mxu0 %v418_v51  ;;  %850 = vmatprep.subr.bf16.mxu1 %v418_v51 }
 0x171   : > { %484 = vmatpush1.bf16.msra.mxu0 %v417_v53  ;;  %852 = vmatpush1.bf16.msra.mxu1 %v417_v53 }
 0x174   : > { %831 = vmatmul.mubr.msk.bf16.vlgmr.msra.gmra.mxu0 %vm453_vm2, %v874_v54  ;;  %832 = vmatmul.mubr.msk.bf16.vlgmr.msra.gmra.mxu1 %vm453_vm2, %v875_v55 }
 0x175   : > { %521 = vmatprep.mubr.bf16.mxu1 %v887_v1 }
 0x17c   : > { %833 = vmatmul.mubr.msk.bf16.gmra.mxu1 %vm453_vm2, %v876_v56 }
 0x17d   : > { %531 = vmatprep.mubr.bf16.mxu1 %v887_v1 }
 0x184   : > { %834 = vmatmul.mubr.msk.bf16.gmra.mxu1 %vm453_vm2, %v877_v57 }
 0x185   : > { %541 = vmatprep.mubr.bf16.mxu1 %v887_v1 }
 0x18c   : > { %835 = vmatmul.mubr.msk.bf16.gmra.mxu1 %vm453_vm2, %v878_v58 }
 0x234   : > { %v503_v59 = vpop.f32.mrf.mxu0  ;;  %v513_v60 = vpop.f32.mrf.mxu1 }
 0x235   : > { %550 = vrot.lane.b32.xlu0 %v503_v59, %s888_s12 }
 0x236   : > { %v505_v61 = vpop.f32.mrf.mxu0  ;;  %v515_v62 = vpop.f32.mrf.mxu1 }
 0x237   : > { %552 = vrot.lane.b32.xlu1 %v505_v61, %s888_s12  ;;  %v839_v61 = vld [vmem:[%s1082_s6 + $0xa] sm:$0x3] }
 0x238   : > { %v517_v63 = vpop.f32.mrf.mxu1  ;;  %v507_v0 = vpop.f32.mrf.mxu0 }
 0x239   : > { %599 = vrot.lane.b32.xlu0 %v513_v60, %s889_s13 }
 0x23a   : > { %v519_v2 = vpop.f32.mrf.mxu1  ;;  %v509_v1 = vpop.f32.mrf.mxu0 }
 0x23b   : > { %601 = vrot.lane.b32.xlu1 %v515_v62, %s889_s13 }
 0x23c   : > { %v1000_v3 = vpop.f32.mrf.mxu1 }
 0x23d   : > { %575 = vrot.lane.b32.xlu0 %v507_v0, %s890_s14  ;;  %v840_v0 = vld [vmem:[%s1082_s6 + $0xc] sm:$0x3] }
 0x23e   : > { %v1002_v4 = vpop.f32.mrf.mxu1 }
 0x23f   : > { %577 = vrot.lane.b32.xlu1 %v509_v1, %s890_s14 }
 0x240   : > { %v527_v5 = vpop.f32.mrf.mxu1 }
 0x241   : > { %623 = vrot.lane.b32.xlu0 %v517_v63, %s891_s16  ;;  %v662_v63 = vrot.slane %v839_v61, %v1006_v20 }
 0x242   : > { %v529_v6 = vpop.f32.mrf.mxu1 }
 0x243   : > { %625 = vrot.lane.b32.xlu1 %v519_v2, %s891_s16 }
 0x244   : > { %v533_v7 = vpop.f32.mrf.mxu1 }
 0x245   : > { %649 = vrot.lane.b32.xlu0 %v527_v5, %s892_s17  ;;  %v666_v5 = vrot.slane %v839_v61, %v1008_v21 }
 0x246   : > { %v535_v8 = vpop.f32.mrf.mxu1 }
 0x247   : > { %651 = vrot.lane.b32.xlu1 %v529_v6, %s892_s17 }
 0x248   : > { %v537_v9 = vpop.f32.mrf.mxu1 }
 0x249   : > { %673 = vrot.lane.b32.xlu0 %v533_v7, %s893_s18  ;;  %v841_v7 = vld [vmem:[%s1082_s6 + $0xe] sm:$0x3] }
 0x24a   : > { %v539_v10 = vpop.f32.mrf.mxu1  ;;  %v710_v15 = vrot.slane %v841_v7, %v1006_v20  ;;  %v714_v16 = vrot.slane %v841_v7, %v1008_v21 }
 0x24b   : > { %675 = vrot.lane.b32.xlu1 %v535_v8, %s893_s18 }
 0x24c   : > { %v543_v11 = vpop.f32.mrf.mxu1 }
 0x24d   : > { %697 = vrot.lane.b32.xlu0 %v537_v9, %s894_s19 }
 0x24e   : > { %v545_v12 = vpop.f32.mrf.mxu1 }
 0x24f   : > { %699 = vrot.lane.b32.xlu1 %v539_v10, %s894_s19  ;;  %v686_v10 = vrot.slane %v840_v0, %v1006_v20  ;;  %s782_s19 = scalar_lea.vmem %s1083_s7, %s847_s15 }
 0x250   : > { %v547_v13 = vpop.f32.mrf.mxu1 }
 0x251   : > { %721 = vrot.lane.b32.xlu0 %v543_v11, %s895_s20  ;;  %v690_v11 = vrot.slane %v840_v0, %v1008_v21 }
 0x252   : > { %v548_v14 = vpop.f32.mrf.mxu1 }
 0x253   : > { %723 = vrot.lane.b32.xlu1 %v545_v12, %s895_s20 }
 0x2a7   : > { %v551_v17 = vpop.permute.xlu0 %550 }
 0x2a9   : > { %v553_v19 = vpop.permute.xlu1 %552 }
 0x2aa   : > { %v557_v33 = vsel %vm556_vm3, %v551_v17, %v553_v19  ;;  %v558_v34 = vsel %vm556_vm3, %v553_v19, %v551_v17 }
 0x2ab   : > { %v600_v23 = vpop.permute.xlu0 %599  ;;  %v571_v44 = vmul.f32 %v564_v27, %v558_v34  ;;  %v572_v45 = vmul.f32 %v568_v28, %v557_v33 }
 0x2ad   : > { %v602_v26 = vpop.permute.xlu1 %601 }
 0x2ae   : > { %v604_v40 = vsel %vm603_vm4, %v600_v23, %v602_v26  ;;  %v605_v41 = vsel %vm603_vm4, %v602_v26, %v600_v23 }
 0x2af   : > { %v576_v30 = vpop.permute.xlu0 %575  ;;  %v619_v49 = vmul.f32 %v612_v35, %v605_v41  ;;  %v620_v50 = vmul.f32 %v616_v36, %v604_v40 }
 0x2b1   : > { %v578_v37 = vpop.permute.xlu1 %577 }
 0x2b2   : > { %v580_v42 = vsel %vm579_vm5, %v576_v30, %v578_v37  ;;  %v581_v43 = vsel %vm579_vm5, %v578_v37, %v576_v30  ;;  %v738_v30 = vrot.slane %v842_v25, %v1008_v21 }
 0x2b3   : > { %v595_v46 = vmul.f32 %v588_v31, %v581_v43  ;;  %v596_v47 = vmul.f32 %v592_v32, %v580_v42  ;;  %v624_v48 = vpop.permute.xlu0 %623 }
 0x2b5   : > { %v597_v51 = vadd.f32 %v595_v46, %v571_v44  ;;  %v598_v52 = vadd.f32 %v596_v47, %v572_v45  ;;  %v626_v53 = vpop.permute.xlu1 %625 }
 0x2b6   : > { %v628_v54 = vsel %vm627_vm6, %v624_v48, %v626_v53  ;;  %v629_v55 = vsel %vm627_vm6, %v626_v53, %v624_v48 }
 0x2b7   : > { %v621_v56 = vadd.f32 %v619_v49, %v597_v51  ;;  %v622_v57 = vadd.f32 %v620_v50, %v598_v52  ;;  %v643_v58 = vmul.f32 %v636_v38, %v629_v55  ;;  %v644_v59 = vmul.f32 %v640_v39, %v628_v54  ;;  %v650_v60 = vpop.permute.xlu0 %649 }
 0x2b9   : > { %v652_v62 = vpop.permute.xlu1 %651  ;;  %v645_v2 = vadd.f32 %v643_v58, %v621_v56  ;;  %v646_v1 = vadd.f32 %v644_v59, %v622_v57 }
 0x2ba   : > { %v654_v8 = vsel %vm653_vm7, %v650_v60, %v652_v62  ;;  %v655_v9 = vsel %vm653_vm7, %v652_v62, %v650_v60 }
 0x2bb   : > { %v674_v6 = vpop.permute.xlu0 %673  ;;  %v647_v17 = vadd.f32 %v645_v2, %v1000_v3  ;;  %v648_v19 = vadd.f32 %v646_v1, %v1002_v4  ;;  %v669_v22 = vmul.f32 %v662_v63, %v654_v8  ;;  %v670_v23 = vmul.f32 %v666_v5, %v655_v9 }
 0x2bc   : > { %v734_v4 = vrot.slane %v842_v25, %v1006_v20 }
 0x2bd   : > { %v676_v12 = vpop.permute.xlu1 %675  ;;  %v671_v31 = vadd.f32 %v669_v22, %v647_v17  ;;  %v672_v32 = vadd.f32 %v670_v23, %v648_v19 }
 0x2be   : > { %v678_v13 = vsel %vm677_vm8, %v674_v6, %v676_v12  ;;  %v679_v14 = vsel %vm677_vm8, %v676_v12, %v674_v6 }
 0x2bf   : > { %v698_v24 = vpop.permute.xlu0 %697  ;;  %v693_v26 = vmul.f32 %v686_v10, %v678_v13  ;;  %v694_v27 = vmul.f32 %v690_v11, %v679_v14 }
 0x2c1   : > { %v700_v28 = vpop.permute.xlu1 %699  ;;  %v695_v35 = vadd.f32 %v693_v26, %v671_v31  ;;  %v696_v36 = vadd.f32 %v694_v27, %v672_v32 }
 0x2c2   : > { %v702_v29 = vsel %vm701_vm9, %v698_v24, %v700_v28  ;;  %v703_v3 = vsel %vm701_vm9, %v700_v28, %v698_v24 }
 0x2c3   : > { %v717_v33 = vmul.f32 %v710_v15, %v702_v29  ;;  %v718_v34 = vmul.f32 %v714_v16, %v703_v3  ;;  %v722_v37 = vpop.permute.xlu0 %721 }
 0x2c5   : > { %v724_v38 = vpop.permute.xlu1 %723  ;;  %v719_v41 = vadd.f32 %v717_v33, %v695_v35  ;;  %v720_v42 = vadd.f32 %v718_v34, %v696_v36 }
 0x2c6   : > { %v726_v39 = vsel %vm725_vm10, %v722_v37, %v724_v38  ;;  %v727_v40 = vsel %vm725_vm10, %v724_v38, %v722_v37 }
 0x2c7   : > { %v741_v43 = vmul.f32 %v734_v4, %v726_v39  ;;  %v742_v18 = vmul.f32 %v738_v30, %v727_v40 }
 0x2c9   : > { %v743_v20 = vadd.f32 %v741_v43, %v719_v41  ;;  %v744_v21 = vadd.f32 %v742_v18, %v720_v42 }
 0x2cb   : > { %843 = vst [vmem:[%s782_s19 + $0x10] sm:$0xff] %v743_v20  ;;  %844 = vst [vmem:[%s782_s19 + $0x18] sm:$0xff] %v744_v21 }
 0x2cc PF: > { %s17_s24 = sadd.s32 1, %s885_s24  }
 0x2cd   : > { %p14_p4 = scmp.ge.s32.totalorder %s17_s24, 4  }
 0x2cf   :  { %16 = sbr.rel (!%p14_p4) target bundleno = 1 (0x1), region = 85 }

</bundles_post_ra>
